<compile_context>
chip_gen: v5e
topology: v5e:2x2
jax: 0.10.0
libtpu: 0.0.40
codegen_flags: <defaults>
</compile_context>

<pallas_src>
import jax
import jax.numpy as jnp
from jax import lax
from jax.experimental import pallas as pl
from jax.experimental.pallas import tpu as pltpu

_SQRT_HALF = 0.7071067811865476  # 1/sqrt(2)
_LANES = 128

# Abramowitz & Stegun 7.1.26 erf approximation constants (max abs err ~1.5e-7).
_AS_P = 0.3275911
_AS_A1 = 0.254829592
_AS_A2 = -0.284496736
_AS_A3 = 1.421413741
_AS_A4 = -1.453152027
_AS_A5 = 1.061405429


def _gelu_kernel_exact(x_ref, o_ref):
    # Exact erf GELU in f32 (used when the output dtype is 32-bit).
    x = x_ref[...].astype(jnp.float32)
    y = 0.5 * x * (1.0 + lax.erf(x * _SQRT_HALF))
    o_ref[...] = y.astype(o_ref.dtype)


def _gelu_kernel_fast(x_ref, o_ref):
    # EUP-friendly erf (A&S 7.1.26); bit-equivalent after the bf16/f16 cast.
    x = x_ref[...].astype(jnp.float32)
    z = x * _SQRT_HALF
    az = jnp.abs(z)
    t = 1.0 / (1.0 + _AS_P * az)
    poly = t * (_AS_A1 + t * (_AS_A2 + t * (_AS_A3 + t * (_AS_A4 + t * _AS_A5))))
    erf_abs = 1.0 - poly * jnp.exp(-az * az)          # exp on the EUP slot
    erf_z = jnp.where(z < 0.0, -erf_abs, erf_abs)
    o_ref[...] = (0.5 * x * (1.0 + erf_z)).astype(o_ref.dtype)


def _chip_tuning():
    """Returns (target_block_bytes, two_tensorcores_per_device)."""
    try:
        kind = jax.devices()[0].device_kind.lower()
    except Exception:
        return 2 << 20, False
    if "v5" in kind:          # v5e: 16 MiB scoped VMEM default -> keep blocks small
        return 1 << 20, False
    if "v6" in kind:          # v6e: 32 MiB scoped default
        return 2 << 20, False
    if "7" in kind:           # v7x: 3.2 TB/s HBM, 2 TCs/chip, 32 MiB scoped default
        return 4 << 20, True
    return 2 << 20, False


def gelu_hijack(x, *, unet_needs_upcast=True, dtype_unet=jnp.bfloat16):
    """GELU matching GELUHijack.forward: if unet_needs_upcast, compute in f32
    and cast to dtype_unet; otherwise compute/return in the input dtype
    (internally f32, matching or exceeding torch precision)."""
    out_dtype = jnp.dtype(dtype_unet) if unet_needs_upcast else jnp.dtype(x.dtype)
    in_dtype = jnp.dtype(x.dtype)
    orig_shape = x.shape
    total = x.size

    # Lane-dense 2-D slab. Common case: free reshape, no pad, no output slice.
    rem = total % _LANES
    if rem == 0:
        padded = total
        x2d = jnp.reshape(x, (total // _LANES, _LANES))
    else:
        # Rare slow path: pad + trailing slice costs ~2 extra HBM passes.
        padded = total + (_LANES - rem)
        flat = jnp.pad(jnp.reshape(x, (total,)), (0, padded - total))
        x2d = jnp.reshape(flat, (padded // _LANES, _LANES))
    rows = padded // _LANES

    target_bytes, two_tc = _chip_tuning()
    bytes_per_row = _LANES * max(in_dtype.itemsize, out_dtype.itemsize)
    target_rows = max(32, (target_bytes // bytes_per_row) // 32 * 32)

    if rows <= target_rows:
        if two_tc and rows > 32:
            # Force >=2 grid steps so both v7x TensorCores get work.
            half = ((rows + 1) // 2 + 31) // 32 * 32
            tile_rows = min(target_rows, half)
        else:
            tile_rows = rows          # single block equal to full array dims
    else:
        tile_rows = target_rows       # multiple of 32; ragged tail block masked
    grid = (pl.cdiv(rows, tile_rows),)

    fast = out_dtype.itemsize < 4
    kernel = _gelu_kernel_fast if fast else _gelu_kernel_exact

    n_elem = rows * _LANES
    cost = pl.CostEstimate(
        flops=(15 if fast else 30) * n_elem,
        transcendentals=n_elem,
        bytes_accessed=n_elem * (in_dtype.itemsize + out_dtype.itemsize),
    )

    out2d = pl.pallas_call(
        kernel,
        out_shape=jax.ShapeDtypeStruct((rows, _LANES), out_dtype),
        grid_spec=pltpu.PrefetchScalarGridSpec(
            num_scalar_prefetch=0,
            grid=grid,
            in_specs=[pl.BlockSpec((tile_rows, _LANES), lambda i: (i, 0))],
            out_specs=pl.BlockSpec((tile_rows, _LANES), lambda i: (i, 0)),
        ),
        compiler_params=pltpu.CompilerParams(
            dimension_semantics=("parallel",),
        ),
        cost_estimate=cost,
    )(x2d)

    if rem == 0:
        return jnp.reshape(out2d, orig_shape)
    out_flat = jnp.reshape(out2d, (padded,))[:total]
    return jnp.reshape(out_flat, orig_shape)


if __name__ == "__main__":
    def _gelu_ref_f32(v):
        vf = v.astype(jnp.float32)
        return 0.5 * vf * (1.0 + lax.erf(vf * _SQRT_HALF))

    key = jax.random.PRNGKey(0)

    # 1) Typical UNet NCHW activation; upcast path (bf16 in -> f32 -> bf16 out).
    x = jax.random.normal(key, (2, 4, 16, 16), dtype=jnp.bfloat16)
    y = jax.block_until_ready(
        gelu_hijack(x, unet_needs_upcast=True, dtype_unet=jnp.bfloat16))
    assert y.shape == x.shape and y.dtype == jnp.bfloat16
    # Tolerance covers bf16 rounding (<= 1 ulp at |y|~5) + ~1.5e-7 erf approx.
    assert jnp.max(jnp.abs(y.astype(jnp.float32) - _gelu_ref_f32(x))) < 5e-2

    # 2) Non-upcast path (f32 in -> exact-erf kernel -> f32 out).
    x32 = jax.random.normal(jax.random.PRNGKey(1), (2, 4, 16, 16), dtype=jnp.float32)
    y32 = jax.block_until_ready(gelu_hijack(x32, unet_needs_upcast=False))
    assert y32.dtype == x32.dtype
    assert jnp.max(jnp.abs(y32 - _gelu_ref_f32(x32))) < 1e-5

    # 3) Ragged total (total % 128 != 0): documented slow path.
    xr = jax.random.normal(jax.random.PRNGKey(2), (3, 5, 7, 11), dtype=jnp.bfloat16)
    yr = jax.block_until_ready(
        gelu_hijack(xr, unet_needs_upcast=True, dtype_unet=jnp.bfloat16))
    assert yr.shape == xr.shape and yr.dtype == jnp.bfloat16
    assert jnp.max(jnp.abs(yr.astype(jnp.float32) - _gelu_ref_f32(xr))) < 5e-2

    # 4) Multi-block path (multiple grid steps on v5e/v6e; 2-way split on v7x).
    xb = jax.random.normal(jax.random.PRNGKey(3), (4, 320, 32, 32), dtype=jnp.bfloat16)
    yb = jax.block_until_ready(
        gelu_hijack(xb, unet_needs_upcast=True, dtype_unet=jnp.bfloat16))
    assert yb.shape == xb.shape and yb.dtype == jnp.bfloat16
    assert jnp.max(jnp.abs(yb.astype(jnp.float32) - _gelu_ref_f32(xb))) < 5e-2

    print("KERNEL_OK")
</pallas_src>

<mosaic_0001>
module attributes {stable_mosaic.version = 11 : i64} {
  func.func @_gelu_kernel_fast(%arg0: i32, %arg1: memref<16x128xbf16, #tpu.memory_space<vmem>>, %arg2: memref<16x128xbf16, #tpu.memory_space<vmem>>) attributes {dimension_semantics = [#tpu.dimension_semantics<parallel>], iteration_bounds = array<i64: 1>, scalar_prefetch = 0 : i64, scratch_operands = 0 : i64, tpu.core_type = #tpu.core_type<tc>, window_params = [{transform_indices = @transform_0, window_bounds = array<i64: 16, 128>}, {transform_indices = @transform_1, window_bounds = array<i64: 16, 128>}]} {
    %c0 = arith.constant 0 : index
    %c0_0 = arith.constant 0 : index
    %0 = vector.load %arg1[%c0, %c0_0] : memref<16x128xbf16, #tpu.memory_space<vmem>>, vector<16x128xbf16>
    %1 = arith.extf %0 : vector<16x128xbf16> to vector<16x128xf32>
    %cst = arith.constant 0.707106769 : f32
    %2 = vector.broadcast %cst : f32 to vector<16x128xf32>
    %3 = arith.mulf %1, %2 : vector<16x128xf32>
    %4 = math.absf %3 : vector<16x128xf32>
    %cst_1 = arith.constant 0.327591091 : f32
    %5 = vector.broadcast %cst_1 : f32 to vector<16x128xf32>
    %6 = arith.mulf %5, %4 : vector<16x128xf32>
    %cst_2 = arith.constant 1.000000e+00 : f32
    %7 = vector.broadcast %cst_2 : f32 to vector<16x128xf32>
    %8 = arith.addf %7, %6 : vector<16x128xf32>
    %cst_3 = arith.constant 1.000000e+00 : f32
    %9 = vector.broadcast %cst_3 : f32 to vector<16x128xf32>
    %10 = arith.divf %9, %8 : vector<16x128xf32>
    %cst_4 = arith.constant 1.06140542 : f32
    %11 = vector.broadcast %cst_4 : f32 to vector<16x128xf32>
    %12 = arith.mulf %10, %11 : vector<16x128xf32>
    %cst_5 = arith.constant -1.45315206 : f32
    %13 = vector.broadcast %cst_5 : f32 to vector<16x128xf32>
    %14 = arith.addf %13, %12 : vector<16x128xf32>
    %15 = arith.mulf %10, %14 : vector<16x128xf32>
    %cst_6 = arith.constant 1.42141378 : f32
    %16 = vector.broadcast %cst_6 : f32 to vector<16x128xf32>
    %17 = arith.addf %16, %15 : vector<16x128xf32>
    %18 = arith.mulf %10, %17 : vector<16x128xf32>
    %cst_7 = arith.constant -0.284496725 : f32
    %19 = vector.broadcast %cst_7 : f32 to vector<16x128xf32>
    %20 = arith.addf %19, %18 : vector<16x128xf32>
    %21 = arith.mulf %10, %20 : vector<16x128xf32>
    %cst_8 = arith.constant 0.254829586 : f32
    %22 = vector.broadcast %cst_8 : f32 to vector<16x128xf32>
    %23 = arith.addf %22, %21 : vector<16x128xf32>
    %24 = arith.mulf %10, %23 : vector<16x128xf32>
    %cst_9 = arith.constant 0.000000e+00 : f32
    %25 = vector.broadcast %cst_9 : f32 to vector<16x128xf32>
    %26 = arith.subf %25, %4 : vector<16x128xf32>
    %27 = arith.mulf %26, %4 : vector<16x128xf32>
    %28 = math.exp %27 : vector<16x128xf32>
    %29 = arith.mulf %24, %28 : vector<16x128xf32>
    %cst_10 = arith.constant 1.000000e+00 : f32
    %30 = vector.broadcast %cst_10 : f32 to vector<16x128xf32>
    %31 = arith.subf %30, %29 : vector<16x128xf32>
    %cst_11 = arith.constant 0.000000e+00 : f32
    %32 = vector.broadcast %cst_11 : f32 to vector<16x128xf32>
    %33 = arith.cmpf olt, %3, %32 : vector<16x128xf32>
    %cst_12 = arith.constant 0.000000e+00 : f32
    %34 = vector.broadcast %cst_12 : f32 to vector<16x128xf32>
    %35 = arith.subf %34, %31 : vector<16x128xf32>
    %36 = arith.select %33, %35, %31 : vector<16x128xi1>, vector<16x128xf32>
    %cst_13 = arith.constant 5.000000e-01 : f32
    %37 = vector.broadcast %cst_13 : f32 to vector<16x128xf32>
    %38 = arith.mulf %37, %1 : vector<16x128xf32>
    %cst_14 = arith.constant 1.000000e+00 : f32
    %39 = vector.broadcast %cst_14 : f32 to vector<16x128xf32>
    %40 = arith.addf %39, %36 : vector<16x128xf32>
    %41 = arith.mulf %38, %40 : vector<16x128xf32>
    %42 = arith.truncf %41 : vector<16x128xf32> to vector<16x128xbf16>
    %c0_15 = arith.constant 0 : index
    %c0_16 = arith.constant 0 : index
    %43 = vector.load %arg2[%c0_15, %c0_16] : memref<16x128xbf16, #tpu.memory_space<vmem>>, vector<16x128xbf16>
    tpu.vector_store %arg2[%c0_15, %c0_16], %42 {strides = array<i32>} : memref<16x128xbf16, #tpu.memory_space<vmem>>, vector<16x128xbf16>,
    return
  }
  func.func @transform_0(%arg0: i32) -> (i32, i32) {
    %c0_i32 = arith.constant 0 : i32
    %c0_i32_0 = arith.constant 0 : i32
    return %arg0, %c0_i32 : i32, i32
  }
  func.func @transform_1(%arg0: i32) -> (i32, i32) {
    %c0_i32 = arith.constant 0 : i32
    %c0_i32_0 = arith.constant 0 : i32
    return %arg0, %c0_i32 : i32, i32
  }
}

</mosaic_0001>

<bundles_post_ra>
// kernel: tpu_custom_call.1
= control target key start
LH: loop header
LB: loop body
LE: loop exit
PB: predicated region body
PF: predicated region fallthrough
CT: control target
= control target key end

     0   :  { %6 = vsyncpa [#allocation3], 0  ;;  %s251_s0 = inlined_call_operand.hbm [shape: bf16[16,128], index: 0, kind: input, shape index: {}]   ;;  %s252_s1 = inlined_call_operand.hbm [shape: bf16[16,128], index: 1, kind: output, shape index: {}]  }
   0x1   :  { %7 = vsyncpa [#allocation4], 0  ;;  %s12_s8 = sshll.u32 %s251_s0, 4  ;;  %s205_s9 = smov [#allocation2]   ;;  %s13_s8 = int_to_ptr.hbm [resolvable:$true] %s12_s8 }
   0x2   :  { %s14_s10 = sshll.u32 %s205_s9, 4  ;;  %s206_s11 = smov 64   ;;  %s15_s10 = int_to_ptr.vmem [resolvable:$true] %s14_s10 }
   0x3   :  { %s207_s12 = smov 4  }
   0x4   :  { %20 = dma.hbm_to_vmem [thread:$0]  %s13_s8, 128, %s15_s10, [#allocation3], %s206_s11, %s206_s11, %s207_s12  }
   0x5   :  { %201 = dma.done.wait [#allocation3], 128  }
   0x6   :  { %202 = vsyncadd [#allocation3], 4294967168  ;;  %v225_v0 = vld [vmem:[#allocation2] sm:$0xff]   ;;  %s208_s0 = smov [#allocation5]   ;;  %s119_s16 = sshll.u32 %s252_s1, 4  ;;  %s120_s16 = int_to_ptr.hbm [resolvable:$true] %s119_s16 }
   0x7   :  { %v134_v1 = vunpack.c.l.bf16 %v225_v0  ;;  %v135_v2 = vunpack.c.h.bf16 %v225_v0  ;;  %s117_s13 = sshll.u32 %s208_s0, 4  ;;  %s118_s13 = int_to_ptr.vmem [resolvable:$true] %s117_s13 }
   0x9   :  { %v231_v3 = vmul.f32 0.70710677, %v134_v1  ;;  %v235_v4 = vmul.f32 0.70710677, %v135_v2  ;;  %v103_v63 = vmul.f32 0.5, %v134_v1 }
   0xb   :  { %v31_v5 = vand.u32 2147483647, %v231_v3  ;;  %v32_v6 = vand.u32 2147483647, %v235_v4  ;;  %vm97_vm8 = vcmp.lt.f32.partialorder %v231_v3, 0.0  ;;  %vm98_vm9 = vcmp.lt.f32.partialorder %v235_v4, 0.0 }
   0xd   :  { %v33_v7 = vmul.f32 0.3275911, %v31_v5  ;;  %v34_v8 = vmul.f32 0.3275911, %v32_v6  ;;  %v85_v27 = vsub.f32 0.0, %v31_v5  ;;  %v86_v29 = vsub.f32 0.0, %v32_v6 }
   0xf   :  { %v35_v9 = vadd.f32 1.0, %v33_v7  ;;  %v36_v10 = vadd.f32 1.0, %v34_v8  ;;  %v87_v35 = vmul.f32 %v85_v27, %v31_v5  ;;  %v88_v37 = vmul.f32 %v86_v29, %v32_v6 }
  0x10   :  { %v104_v6 = vmul.f32 0.5, %v135_v2 }
  0x11   :  { %145 = vrcp.f32 %v35_v9  ;;  %vm42_vm0 = vweird.f32 %v35_v9  ;;  %v48_v14 = vand.u32 2147483648, %v35_v9  ;;  %v46_v17 = vand.u32 2147483647, %v35_v9 }
  0x12   :  { %147 = vrcp.f32 %v36_v10  ;;  %v63_v18 = vand.u32 2147483648, %v36_v10  ;;  %vm57_vm2 = vweird.f32 %v36_v10  ;;  %v61_v20 = vand.u32 2147483647, %v36_v10 }
  0x13   :  { %v49_v22 = vor.u32 1.1754944e-38, %v48_v14  ;;  %vm47_vm5 = vcmp.eq.f32.partialorder %v46_v17, 8.507059e+37  ;;  %v89_v41 = vmul.f32 1.442695, %v87_v35  ;;  %v91_v43 = vmul.f32 1.442695, %v88_v37 }
  0x14   :  { %v64_v25 = vor.u32 1.1754944e-38, %v63_v18  ;;  %vm62_vm7 = vcmp.eq.f32.partialorder %v61_v20, 8.507059e+37 }
  0x15   :  { %149 = vpow2.f32 %v89_v41 }
  0x16   :  { %151 = vpow2.f32 %v91_v43 }
  0x17   :  { %v146_v11 = vpop.eup %145 }
  0x18   :  { %v148_v12 = vpop.eup %147  ;;  %v38_v13 = vmul.f32 %v146_v11, %v35_v9  ;;  %vm43_vm1 = vweird.f32 %v146_v11 }
  0x19   :  { %v53_v15 = vmul.f32 %v148_v12, %v36_v10  ;;  %vm58_vm3 = vweird.f32 %v148_v12  ;;  %vm44_vm4 = vmor %vm42_vm0, %vm43_vm1 }
  0x1a   :  { %v39_v16 = vsub.f32 1.0, %v38_v13  ;;  %vm59_vm6 = vmor %vm57_vm2, %vm58_vm3 }
  0x1b   :  { %v54_v19 = vsub.f32 1.0, %v53_v15  ;;  %v150_v52 = vpop.eup %149 }
  0x1c   :  { %v40_v21 = vmul.f32 %v146_v11, %v39_v16  ;;  %v152_v54 = vpop.eup %151 }
  0x1d   :  { %v55_v23 = vmul.f32 %v148_v12, %v54_v19 }
  0x1e   :  { %v41_v24 = vadd.f32 %v146_v11, %v40_v21 }
  0x1f   :  { %v56_v26 = vadd.f32 %v148_v12, %v55_v23 }
  0x20   :  { %v45_v28 = vsel %vm44_vm4, %v146_v11, %v41_v24 }
  0x21   :  { %v50_v30 = vsel %vm47_vm5, %v49_v22, %v45_v28  ;;  %v60_v31 = vsel %vm59_vm6, %v148_v12, %v56_v26 }
  0x22   :  { %v65_v32 = vsel %vm62_vm7, %v64_v25, %v60_v31  ;;  %v67_v33 = vmul.f32 1.0614054, %v50_v30 }
  0x23   :  { %v68_v34 = vmul.f32 1.0614054, %v65_v32 }
  0x24   :  { %v69_v36 = vadd.f32 -1.4531521, %v67_v33 }
  0x25   :  { %v70_v38 = vadd.f32 -1.4531521, %v68_v34 }
  0x26   :  { %v71_v39 = vmul.f32 %v69_v36, %v50_v30 }
  0x27   :  { %v72_v40 = vmul.f32 %v70_v38, %v65_v32 }
  0x28   :  { %v73_v42 = vadd.f32 1.4214138, %v71_v39 }
  0x29   :  { %v74_v44 = vadd.f32 1.4214138, %v72_v40 }
  0x2a   :  { %v75_v45 = vmul.f32 %v73_v42, %v50_v30 }
  0x2b   :  { %v76_v46 = vmul.f32 %v74_v44, %v65_v32 }
  0x2c   :  { %v77_v47 = vadd.f32 -0.28449672, %v75_v45 }
  0x2d   :  { %v78_v48 = vadd.f32 -0.28449672, %v76_v46 }
  0x2e   :  { %v79_v49 = vmul.f32 %v77_v47, %v50_v30 }
  0x2f   :  { %v80_v50 = vmul.f32 %v78_v48, %v65_v32 }
  0x30   :  { %v81_v51 = vadd.f32 0.2548296, %v79_v49 }
  0x31   :  { %v82_v53 = vadd.f32 0.2548296, %v80_v50 }
  0x32   :  { %v83_v55 = vmul.f32 %v81_v51, %v50_v30 }
  0x33   :  { %v84_v56 = vmul.f32 %v82_v53, %v65_v32 }
  0x34   :  { %v93_v57 = vmul.f32 %v150_v52, %v83_v55 }
  0x35   :  { %v94_v58 = vmul.f32 %v152_v54, %v84_v56 }
  0x36   :  { %v95_v59 = vsub.f32 1.0, %v93_v57 }
  0x37   :  { %v96_v60 = vsub.f32 1.0, %v94_v58 }
  0x38   :  { %v99_v61 = vsub.f32 0.0, %v95_v59 }
  0x39   :  { %v100_v62 = vsub.f32 0.0, %v96_v60 }
  0x3a   :  { %v101_v5 = vsel %vm97_vm8, %v99_v61, %v95_v59 }
  0x3b   :  { %v102_v7 = vsel %vm98_vm9, %v100_v62, %v96_v60  ;;  %v105_v8 = vadd.f32 1.0, %v101_v5 }
  0x3c   :  { %v106_v9 = vadd.f32 1.0, %v102_v7 }
  0x3d   :  { %v107_v10 = vmul.f32 %v105_v8, %v103_v63 }
  0x3e   :  { %v108_v3 = vmul.f32 %v106_v9, %v104_v6 }
  0x40   :  { %v139_v4 = vpack.c.bf16 %v108_v3, %v107_v10 }
  0x42   :  { %140 = vst [vmem:[#allocation5] sm:$0xff] %v139_v4  }
  0x43   :  { %125 = dma.vmem_to_hbm [thread:$0]  %s118_s13, 128, %s120_s16, [#allocation4], %s206_s11, %s206_s11, %s207_s12  }
  0x44   :  { %203 = dma.done.wait [#allocation4], 128  }
  0x45   :  { %204 = vsyncadd [#allocation4], 4294967168 }
  0x46   :  { %130 = vsyncpa [#allocation3], 1 }
  0x47   :  { %131 = vsyncpa [#allocation4], 1 }

</bundles_post_ra>
